<compile_context>
chip_gen: v5e
topology: v5e:2x2
jax: 0.10.0
libtpu: 0.0.40
codegen_flags: <defaults>
</compile_context>

<pallas_src>
import functools

import jax
import jax.numpy as jnp
from jax import lax
from jax.experimental import pallas as pl
from jax.experimental.pallas import tpu as pltpu

_NORM_EPS2 = 1e-24  # (F.normalize eps = 1e-12) ** 2, clamp on the sum of squares


def _proxy_nca_kernel(x_ref, p_ref, labels_ref, loss_ref,
                      m_sc, l_sc, t_sc, *,
                      scale, normalize_embeds, normalize_proxies):
    c_idx = pl.program_id(1)
    num_c = pl.num_programs(1)

    @pl.when(c_idx == 0)
    def _init():
        m_sc[...] = jnp.full(m_sc.shape, -jnp.inf, dtype=jnp.float32)
        l_sc[...] = jnp.zeros_like(l_sc)
        t_sc[...] = jnp.zeros_like(t_sc)

    x = x_ref[...].astype(jnp.float32)          # (TB, F)
    p = p_ref[...].astype(jnp.float32)          # (TC, F)
    tc = p.shape[0]

    if normalize_embeds:
        x = x * lax.rsqrt(jnp.maximum(
            jnp.sum(x * x, axis=1, keepdims=True), _NORM_EPS2))
    if normalize_proxies:
        p = p * lax.rsqrt(jnp.maximum(
            jnp.sum(p * p, axis=1, keepdims=True), _NORM_EPS2))

    # (TB, TC) dot product on the MXU, no explicit transpose of the proxies.
    dot = lax.dot_general(x, p, dimension_numbers=(((1,), (1,)), ((), ())),
                          preferred_element_type=jnp.float32)
    p_sq = jnp.sum(p * p, axis=1)[None, :]      # (1, TC), lane-axis reduce

    # logits = -scale * ||x - p||^2 with the per-row -scale*||x||^2 term
    # dropped (it cancels in the softmax cross-entropy).
    logits = (2.0 * scale) * dot - scale * p_sq  # (TB, TC)

    labels = labels_ref[...]                     # (TB, 1) int32
    class_ids = c_idx * tc + lax.broadcasted_iota(jnp.int32, logits.shape, 1)
    onehot = class_ids == labels
    t_sc[...] += jnp.sum(jnp.where(onehot, logits, 0.0), axis=1, keepdims=True)

    # Online log-sum-exp over the class tiles.
    m_prev = m_sc[...]
    m_new = jnp.maximum(m_prev, jnp.max(logits, axis=1, keepdims=True))
    l_sc[...] = (l_sc[...] * jnp.exp(m_prev - m_new)
                 + jnp.sum(jnp.exp(logits - m_new), axis=1, keepdims=True))
    m_sc[...] = m_new

    @pl.when(c_idx == num_c - 1)
    def _finalize():
        lse = m_sc[...] + jnp.log(l_sc[...])
        loss_ref[...] = lse - t_sc[...]          # -log softmax prob at label


def proxy_nca_loss(embeds, proxies, labels, *, scale=8.0,
                   regularization_weight=0.0, normalize_proxies=True,
                   normalize_embeds=True, block_b=None, block_c=None):
    """ProxyNCA loss (mean over batch of -log softmax(-scale*dist^2)[label])."""
    B, F = embeds.shape
    C, Fp = proxies.shape
    assert F == Fp, (F, Fp)
    block_b = B if block_b is None else block_b
    block_c = C if block_c is None else block_c
    assert B % block_b == 0 and C % block_c == 0, (B, block_b, C, block_c)

    labels2d = labels.reshape(B, 1).astype(jnp.int32)
    kernel = functools.partial(
        _proxy_nca_kernel, scale=float(scale),
        normalize_embeds=normalize_embeds, normalize_proxies=normalize_proxies)

    per_sample = pl.pallas_call(
        kernel,
        out_shape=jax.ShapeDtypeStruct((B, 1), jnp.float32),
        grid_spec=pltpu.PrefetchScalarGridSpec(
            num_scalar_prefetch=0,
            grid=(B // block_b, C // block_c),
            in_specs=[
                pl.BlockSpec((block_b, F), lambda b, c: (b, 0)),
                pl.BlockSpec((block_c, F), lambda b, c: (c, 0)),
                pl.BlockSpec((block_b, 1), lambda b, c: (b, 0)),
            ],
            out_specs=pl.BlockSpec((block_b, 1), lambda b, c: (b, 0)),
            scratch_shapes=[pltpu.VMEM((block_b, 1), jnp.float32)] * 3,
        ),
        compiler_params=pltpu.CompilerParams(
            dimension_semantics=("parallel", "arbitrary")),
    )(embeds, proxies, labels2d)

    # TODO(synk): the reference's `prob[prob != 0]` row filter (only relevant
    # for out-of-range labels / fully-underflowed softmax rows) is not replicated.
    loss = jnp.mean(per_sample)
    if regularization_weight > 0:
        # Tiny side reduction over the un-normalized proxies; kept in plain JAX.
        loss = loss + regularization_weight * jnp.mean(
            jnp.sqrt(jnp.sum(proxies.astype(jnp.float32) ** 2, axis=1)))
    return loss


def _reference(embeds, proxies, labels, scale=8.0, regularization_weight=0.0,
               normalize_proxies=True, normalize_embeds=True):
    """Pure-JAX mirror of the PyTorch forward (sanity check)."""
    x, p = embeds, proxies
    if normalize_embeds:
        x = x / jnp.maximum(jnp.linalg.norm(x, axis=1, keepdims=True), 1e-12)
    if normalize_proxies:
        p = p / jnp.maximum(jnp.linalg.norm(p, axis=1, keepdims=True), 1e-12)
    d2 = jnp.sum((x[:, None, :] - p[None, :, :]) ** 2, axis=-1)
    prob = jax.nn.softmax(-scale * d2, axis=1)
    pos = prob[jnp.arange(x.shape[0]), labels]
    loss = -jnp.mean(jnp.log(pos))
    if regularization_weight > 0:
        loss = loss + regularization_weight * jnp.mean(
            jnp.linalg.norm(proxies, axis=1))
    return loss


if __name__ == "__main__":
    num_classes, num_features, batch, scale = 16, 32, 8, 8.0

    key = jax.random.PRNGKey(0)
    k_p, k_x, k_l = jax.random.split(key, 3)
    # deterministic stand-in for nn.Parameter(torch.randn(num_classes, num_features))
    proxies = jax.random.normal(k_p, (num_classes, num_features), jnp.float32)
    embeds = jax.random.normal(k_x, (batch, num_features), jnp.float32)
    labels = jax.random.randint(k_l, (batch,), 0, num_classes, dtype=jnp.int32)

    # class-tiled path (2 class tiles -> exercises the online-LSE accumulator)
    loss_tiled = proxy_nca_loss(embeds, proxies, labels, scale=scale, block_c=8)
    # single-block path (what these tiny test shapes actually want)
    loss_full = proxy_nca_loss(embeds, proxies, labels, scale=scale)
    loss_tiled, loss_full = jax.block_until_ready((loss_tiled, loss_full))

    ref = _reference(embeds, proxies, labels, scale=scale)
    assert jnp.isfinite(loss_tiled) and jnp.isfinite(loss_full), (loss_tiled, loss_full)
    assert jnp.allclose(loss_tiled, ref, rtol=1e-3, atol=1e-3), (loss_tiled, ref)
    assert jnp.allclose(loss_full, ref, rtol=1e-3, atol=1e-3), (loss_full, ref)

    print("KERNEL_OK")
</pallas_src>

<mosaic_0001>
module attributes {stable_mosaic.version = 11 : i64} {
  func.func @_proxy_nca_kernel(%arg0: i32, %arg1: i32, %arg2: memref<8x32xf32, #tpu.memory_space<vmem>>, %arg3: memref<8x32xf32, #tpu.memory_space<vmem>>, %arg4: memref<8x1xi32, #tpu.memory_space<vmem>>, %arg5: memref<8x1xf32, #tpu.memory_space<vmem>>, %arg6: memref<8x1xf32, #tpu.memory_space<vmem>>, %arg7: memref<8x1xf32, #tpu.memory_space<vmem>>, %arg8: memref<8x1xf32, #tpu.memory_space<vmem>>) attributes {dimension_semantics = [#tpu.dimension_semantics<parallel>, #tpu.dimension_semantics<arbitrary>], iteration_bounds = array<i64: 1, 2>, scalar_prefetch = 0 : i64, scratch_operands = 3 : i64, tpu.core_type = #tpu.core_type<tc>, window_params = [{transform_indices = @transform_0, window_bounds = array<i64: 8, 32>}, {transform_indices = @transform_1, window_bounds = array<i64: 8, 32>}, {transform_indices = @transform_2, window_bounds = array<i64: 8, 1>}, {transform_indices = @transform_3, window_bounds = array<i64: 8, 1>}]} {
    %c0_i32 = arith.constant 0 : i32
    %0 = arith.cmpi eq, %arg1, %c0_i32 : i32
    %1 = arith.extui %0 : i1 to i32
    %c0_i32_0 = arith.constant 0 : i32
    %2 = arith.cmpi ne, %1, %c0_i32_0 : i32
    scf.if %2 {
      %cst_30 = arith.constant 0xFF800000 : f32
      %64 = vector.broadcast %cst_30 : f32 to vector<8x1xf32>
      %c0_31 = arith.constant 0 : index
      %c0_32 = arith.constant 0 : index
      %65 = vector.load %arg6[%c0_31, %c0_32] : memref<8x1xf32, #tpu.memory_space<vmem>>, vector<8x1xf32>
      tpu.vector_store %arg6[%c0_31, %c0_32], %64 {strides = array<i32>} : memref<8x1xf32, #tpu.memory_space<vmem>>, vector<8x1xf32>,
      %cst_33 = arith.constant 0.000000e+00 : f32
      %66 = vector.broadcast %cst_33 : f32 to vector<8x1xf32>
      %c0_34 = arith.constant 0 : index
      %c0_35 = arith.constant 0 : index
      %67 = vector.load %arg7[%c0_34, %c0_35] : memref<8x1xf32, #tpu.memory_space<vmem>>, vector<8x1xf32>
      tpu.vector_store %arg7[%c0_34, %c0_35], %66 {strides = array<i32>} : memref<8x1xf32, #tpu.memory_space<vmem>>, vector<8x1xf32>,
      %cst_36 = arith.constant 0.000000e+00 : f32
      %68 = vector.broadcast %cst_36 : f32 to vector<8x1xf32>
      %c0_37 = arith.constant 0 : index
      %c0_38 = arith.constant 0 : index
      %69 = vector.load %arg8[%c0_37, %c0_38] : memref<8x1xf32, #tpu.memory_space<vmem>>, vector<8x1xf32>
      tpu.vector_store %arg8[%c0_37, %c0_38], %68 {strides = array<i32>} : memref<8x1xf32, #tpu.memory_space<vmem>>, vector<8x1xf32>,
    } else {
    }
    %c0 = arith.constant 0 : index
    %c0_1 = arith.constant 0 : index
    %3 = vector.load %arg2[%c0, %c0_1] : memref<8x32xf32, #tpu.memory_space<vmem>>, vector<8x32xf32>
    %c0_2 = arith.constant 0 : index
    %c0_3 = arith.constant 0 : index
    %4 = vector.load %arg3[%c0_2, %c0_3] : memref<8x32xf32, #tpu.memory_space<vmem>>, vector<8x32xf32>
    %5 = arith.mulf %3, %3 : vector<8x32xf32>
    %cst = arith.constant dense<0.000000e+00> : vector<8xf32>
    %6 = vector.multi_reduction <add>, %5, %cst [1] : vector<8x32xf32> to vector<8xf32>
    %7 = vector.shape_cast %6 : vector<8xf32> to vector<8x1xf32>
    %cst_4 = arith.constant 1.000000e-24 : f32
    %8 = vector.broadcast %cst_4 : f32 to vector<8x1xf32>
    %9 = arith.maximumf %7, %8 : vector<8x1xf32>
    %10 = math.rsqrt %9 : vector<8x1xf32>
    %11 = vector.broadcast %10 : vector<8x1xf32> to vector<8x32xf32>
    %12 = arith.mulf %3, %11 : vector<8x32xf32>
    %13 = arith.mulf %4, %4 : vector<8x32xf32>
    %cst_5 = arith.constant dense<0.000000e+00> : vector<8xf32>
    %14 = vector.multi_reduction <add>, %13, %cst_5 [1] : vector<8x32xf32> to vector<8xf32>
    %15 = vector.shape_cast %14 : vector<8xf32> to vector<8x1xf32>
    %cst_6 = arith.constant 1.000000e-24 : f32
    %16 = vector.broadcast %cst_6 : f32 to vector<8x1xf32>
    %17 = arith.maximumf %15, %16 : vector<8x1xf32>
    %18 = math.rsqrt %17 : vector<8x1xf32>
    %19 = vector.broadcast %18 : vector<8x1xf32> to vector<8x32xf32>
    %20 = arith.mulf %4, %19 : vector<8x32xf32>
    %cst_7 = arith.constant dense<0.000000e+00> : vector<8x8xf32>
    %21 = tpu.matmul %12, %20, %cst_7 {dimension_numbers = #tpu.dot_dimension_numbers<[1], [1], [0], [0], [0, 0, 1, 0], [], []>} : vector<8x32xf32>, vector<8x32xf32>, vector<8x8xf32> -> vector<8x8xf32>
    %22 = arith.mulf %20, %20 : vector<8x32xf32>
    %cst_8 = arith.constant dense<0.000000e+00> : vector<8xf32>
    %23 = vector.multi_reduction <add>, %22, %cst_8 [1] : vector<8x32xf32> to vector<8xf32>
    %24 = vector.shape_cast %23 : vector<8xf32> to vector<1x8xf32>
    %cst_9 = arith.constant 1.600000e+01 : f32
    %25 = vector.broadcast %cst_9 : f32 to vector<8x8xf32>
    %26 = arith.mulf %25, %21 : vector<8x8xf32>
    %cst_10 = arith.constant 8.000000e+00 : f32
    %27 = vector.broadcast %cst_10 : f32 to vector<1x8xf32>
    %28 = arith.mulf %27, %24 : vector<1x8xf32>
    %29 = vector.broadcast %28 : vector<1x8xf32> to vector<8x8xf32>
    %30 = arith.subf %26, %29 : vector<8x8xf32>
    %c0_11 = arith.constant 0 : index
    %c0_12 = arith.constant 0 : index
    %31 = vector.load %arg4[%c0_11, %c0_12] : memref<8x1xi32, #tpu.memory_space<vmem>>, vector<8x1xi32>
    %c8_i32 = arith.constant 8 : i32
    %32 = arith.muli %arg1, %c8_i32 : i32
    %33 = tpu.iota {dimensions = array<i32: 1>} : vector<8x8xi32>
    %34 = vector.broadcast %32 : i32 to vector<8x8xi32>
    %35 = arith.addi %34, %33 : vector<8x8xi32>
    %36 = vector.broadcast %31 : vector<8x1xi32> to vector<8x8xi32>
    %37 = arith.cmpi eq, %35, %36 : vector<8x8xi32>
    %c0_13 = arith.constant 0 : index
    %c0_14 = arith.constant 0 : index
    %38 = vector.load %arg8[%c0_13, %c0_14] : memref<8x1xf32, #tpu.memory_space<vmem>>, vector<8x1xf32>
    %cst_15 = arith.constant 0.000000e+00 : f32
    %39 = vector.broadcast %cst_15 : f32 to vector<8x8xf32>
    %40 = arith.select %37, %30, %39 : vector<8x8xi1>, vector<8x8xf32>
    %cst_16 = arith.constant dense<0.000000e+00> : vector<8xf32>
    %41 = vector.multi_reduction <add>, %40, %cst_16 [1] : vector<8x8xf32> to vector<8xf32>
    %42 = vector.shape_cast %41 : vector<8xf32> to vector<8x1xf32>
    %43 = arith.addf %38, %42 : vector<8x1xf32>
    %c0_17 = arith.constant 0 : index
    %c0_18 = arith.constant 0 : index
    %44 = vector.load %arg8[%c0_17, %c0_18] : memref<8x1xf32, #tpu.memory_space<vmem>>, vector<8x1xf32>
    tpu.vector_store %arg8[%c0_17, %c0_18], %43 {strides = array<i32>} : memref<8x1xf32, #tpu.memory_space<vmem>>, vector<8x1xf32>,
    %c0_19 = arith.constant 0 : index
    %c0_20 = arith.constant 0 : index
    %45 = vector.load %arg6[%c0_19, %c0_20] : memref<8x1xf32, #tpu.memory_space<vmem>>, vector<8x1xf32>
    %cst_21 = arith.constant dense<0xFF800000> : vector<8xf32>
    %46 = vector.multi_reduction <maximumf>, %30, %cst_21 [1] : vector<8x8xf32> to vector<8xf32>
    %47 = vector.shape_cast %46 : vector<8xf32> to vector<8x1xf32>
    %48 = arith.maximumf %45, %47 : vector<8x1xf32>
    %c0_22 = arith.constant 0 : index
    %c0_23 = arith.constant 0 : index
    %49 = vector.load %arg7[%c0_22, %c0_23] : memref<8x1xf32, #tpu.memory_space<vmem>>, vector<8x1xf32>
    %50 = arith.subf %45, %48 : vector<8x1xf32>
    %51 = math.exp %50 : vector<8x1xf32>
    %52 = arith.mulf %49, %51 : vector<8x1xf32>
    %53 = vector.broadcast %48 : vector<8x1xf32> to vector<8x8xf32>
    %54 = arith.subf %30, %53 : vector<8x8xf32>
    %55 = math.exp %54 : vector<8x8xf32>
    %cst_24 = arith.constant dense<0.000000e+00> : vector<8xf32>
    %56 = vector.multi_reduction <add>, %55, %cst_24 [1] : vector<8x8xf32> to vector<8xf32>
    %57 = vector.shape_cast %56 : vector<8xf32> to vector<8x1xf32>
    %58 = arith.addf %52, %57 : vector<8x1xf32>
    %c0_25 = arith.constant 0 : index
    %c0_26 = arith.constant 0 : index
    %59 = vector.load %arg7[%c0_25, %c0_26] : memref<8x1xf32, #tpu.memory_space<vmem>>, vector<8x1xf32>
    tpu.vector_store %arg7[%c0_25, %c0_26], %58 {strides = array<i32>} : memref<8x1xf32, #tpu.memory_space<vmem>>, vector<8x1xf32>,
    %c0_27 = arith.constant 0 : index
    %c0_28 = arith.constant 0 : index
    %60 = vector.load %arg6[%c0_27, %c0_28] : memref<8x1xf32, #tpu.memory_space<vmem>>, vector<8x1xf32>
    tpu.vector_store %arg6[%c0_27, %c0_28], %48 {strides = array<i32>} : memref<8x1xf32, #tpu.memory_space<vmem>>, vector<8x1xf32>,
    %c1_i32 = arith.constant 1 : i32
    %61 = arith.cmpi eq, %arg1, %c1_i32 : i32
    %62 = arith.extui %61 : i1 to i32
    %c0_i32_29 = arith.constant 0 : i32
    %63 = arith.cmpi ne, %62, %c0_i32_29 : i32
    scf.if %63 {
      %c0_30 = arith.constant 0 : index
      %c0_31 = arith.constant 0 : index
      %64 = vector.load %arg6[%c0_30, %c0_31] : memref<8x1xf32, #tpu.memory_space<vmem>>, vector<8x1xf32>
      %c0_32 = arith.constant 0 : index
      %c0_33 = arith.constant 0 : index
      %65 = vector.load %arg7[%c0_32, %c0_33] : memref<8x1xf32, #tpu.memory_space<vmem>>, vector<8x1xf32>
      %66 = math.log %65 : vector<8x1xf32>
      %67 = arith.addf %64, %66 : vector<8x1xf32>
      %c0_34 = arith.constant 0 : index
      %c0_35 = arith.constant 0 : index
      %68 = vector.load %arg8[%c0_34, %c0_35] : memref<8x1xf32, #tpu.memory_space<vmem>>, vector<8x1xf32>
      %69 = arith.subf %67, %68 : vector<8x1xf32>
      %c0_36 = arith.constant 0 : index
      %c0_37 = arith.constant 0 : index
      %70 = vector.load %arg5[%c0_36, %c0_37] : memref<8x1xf32, #tpu.memory_space<vmem>>, vector<8x1xf32>
      tpu.vector_store %arg5[%c0_36, %c0_37], %69 {strides = array<i32>} : memref<8x1xf32, #tpu.memory_space<vmem>>, vector<8x1xf32>,
    } else {
    }
    return
  }
  func.func @transform_0(%arg0: i32, %arg1: i32) -> (i32, i32) {
    %c0_i32 = arith.constant 0 : i32
    %c0_i32_0 = arith.constant 0 : i32
    return %arg0, %c0_i32 : i32, i32
  }
  func.func @transform_1(%arg0: i32, %arg1: i32) -> (i32, i32) {
    %c0_i32 = arith.constant 0 : i32
    %c0_i32_0 = arith.constant 0 : i32
    return %arg1, %c0_i32 : i32, i32
  }
  func.func @transform_2(%arg0: i32, %arg1: i32) -> (i32, i32) {
    %c0_i32 = arith.constant 0 : i32
    %c0_i32_0 = arith.constant 0 : i32
    return %arg0, %c0_i32 : i32, i32
  }
  func.func @transform_3(%arg0: i32, %arg1: i32) -> (i32, i32) {
    %c0_i32 = arith.constant 0 : i32
    %c0_i32_0 = arith.constant 0 : i32
    return %arg0, %c0_i32 : i32, i32
  }
}

</mosaic_0001>

<bundles_post_ra>
// kernel: tpu_custom_call.1
= control target key start
LH: loop header
LB: loop body
LE: loop exit
PB: predicated region body
PF: predicated region fallthrough
CT: control target
= control target key end

     0   :  { %8 = vsyncpa [#allocation6], 0  ;;  %s779_s0 = inlined_call_operand.vmem [shape: f32[8,32], index: 0, kind: input, shape index: {}]   ;;  %s780_s1 = inlined_call_operand.hbm [shape: f32[16,32], index: 1, kind: input, shape index: {}]   ;;  %s781_s2 = inlined_call_operand.vmem [shape: s32[8,1], index: 2, kind: input, shape index: {}]   ;;  %s782_s3 = inlined_call_operand.vmem [shape: f32[8,1], index: 3, kind: output, shape index: {}]  }
   0x1   :  { %10 = vsyncpa [#allocation6 + $0x1], 0  ;;  %s672_s12 = smov 0   ;;  %s674_s13 = smov 0  }
   0x2   :  { %s676_s14 = smov 0   ;;  %s678_s15 = smov 0  }
   0x3   :  { %s680_s16 = smov 0   ;;  %s682_s17 = smov 0  }
   0x4 LB: > { %s480_s18 = sadd.s32 4294967295, %s647_s17   ;;  %s25_s19 = sadd.s32 1, %s643_s16  ;;  %s647_s17 = sphi %s682_s17, %s16_s17   ;;  %s643_s16 = sphi %s680_s16, %s789_s16   ;;  %s639_s15 = sphi %s678_s15, %s788_s15   ;;  %s635_s14 = sphi %s676_s14, %s787_s14   ;;  %s631_s13 = sphi %s674_s13, %s786_s13   ;;  %s627_s12 = sphi %s672_s12, %s785_s12  }
   0x5   : > { %p26_p0 = scmp.ge.s32.totalorder %s25_s19, 2  ;;  %s61_s20 = sadd.s32 1, %s635_s14 }
   0x6   : > { %p68_p1 = scmp.ne.s32.totalorder %s635_s14, %s631_s13  ;;  %p69_p2 = scmp.eq.s32.totalorder %s647_s17, 0 }
   0x7   : > { %s791_s19 = smov (%p26_p0, %s25_s19), 0  ;;  %p74_p4 = scmp.ne.s32.totalorder %s631_s13, %s627_s12 }
   0x8   : > { %p708_p3 = por %p69_p2, %p68_p1  ;;  %s58_s22 = ssub.s32 %s643_s16, %s791_s19 }
   0x9   : > { %p75_p5 = scmp.eq.s32.totalorder %s480_s18, 0  ;;  %p59_p6 = scmp.eq.s32.totalorder %s58_s22, 0 }
   0xa   : > { %p503_p8 = scmp.lt.s32.totalorder %s647_s17, 2  ;;  %s164_s25 = sand.u32 1, %s635_s14  }
   0xb   : > { %p715_p7 = por %p75_p5, %p74_p4  ;;  %s486_s26 = sshll.u32 %s643_s16, 3 }
   0xc   : > { %s721_s24 = scalar_select %p59_p6, %s635_s14, %s61_s20  }
   0xd   : > { %s485_s27 = sshll.u32 %s164_s25, 3  ;;  %s172_s30 = scalar_lea.hbm %s780_s1, %s486_s26 }
   0xe   : > { %s174_s4 = sshll.u32 %s172_s30, 4  ;;  %s168_s5 = scalar_lea.vmem [#allocation5], %s485_s27  ;;  %s175_s4 = int_to_ptr.hbm [resolvable:$true] %s174_s4 }
   0xf   : > { %s176_s6 = sshll.u32 %s168_s5, 4  ;;  %p500_p9 = pnand %p503_p8, %p708_p3  ;;  %s177_s6 = int_to_ptr.vmem [resolvable:$true] %s176_s6 }
  0x10   : > { %p487_p10 = scmp.ge.s32.totalorder %s647_s17, 1  ;;  %p181_p11 = scmp.lt.s32.totalorder %s647_s17, 3 }
  0x11   : > { %s165_s7 = scalar_lea.sflag [#allocation6], %s164_s25 }
  0x12   : > { %502 = dma.hbm_to_vmem [thread:$0]  (!%p500_p9), %s175_s4, 128, %s177_s6, %s165_s7  }
  0x13   : > { %p182_p12 = pnand %p487_p10, %p181_p11 }
  0x14   : > { %s187_s8 = sand.u32 (!%p182_p12), 1, %s631_s13  }
  0x15   : > { %185 = sbr.rel (%p182_p12) target bundleno = 680 (0x2a8), region = 32  ;;  %s488_s9 = sshll.u32 (!%p182_p12), %s187_s8, 3 }
  0x16   : > { %s188_s10 = scalar_lea.sflag (!%p182_p12), [#allocation6], %s187_s8  ;;  %s191_s11 = scalar_lea.vmem (!%p182_p12), [#allocation5], %s488_s9 }
  0x1a   : > { %622 = dma.done.wait (%p715_p7), %s188_s10, 128  }
  0x1b   : > { %624 = vsyncadd (%p715_p7), %s188_s10, 4294967168  ;;  %p489_p13 = scmp.ne.s32.totalorder %s639_s15, 0 }
  0x1d   : > { %237 = sbr.rel (%p489_p13) target bundleno = 38 (0x26), region = 40 }
  0x22   : > { %vm238_vm0 = vcmask 7168   ;;  %v649_v0 = vmov -inf   ;;  %v650_v1 = vmov 0.0  }
  0x23   : > { %239 = vst.msk [vmem:[#allocation2] sm:$0xff] %vm238_vm0, %v649_v0 }
  0x24   : > { %240 = vst.msk [vmem:[#allocation3] sm:$0xff] %vm238_vm0, %v650_v1 }
  0x25   : > { %241 = vst.msk [vmem:[#allocation4] sm:$0xff] %vm238_vm0, %v650_v1 }
  0x26 PF: > { %v243_v2 = vld [vmem:[%s191_s11] sm:$0xff]  ;;  %vm245_vm1 = vcmask 261120   ;;  %v310_v30 = vlaneseq  ;;  %vm337_vm8 = vcmask 64512   ;;  %v651_v39 = vmov 0   ;;  %s492_s22 = sshll.u32 %s639_s15, 3  ;;  %p493_p0 = scmp.ne.s32.totalorder %s639_s15, 1 }
  0x27   : > { %v261_v3 = vmul.f32 %v243_v2, %v243_v2  ;;  %v242_v4 = vld [vmem:[%s779_s0] sm:$0xff]  ;;  %555 = vset.pattern.permute.xlu2 %v651_v39  ;;  %556 = vset.pattern.permute.xlu0 %v651_v39  ;;  %vm342_vm9 = vcmask 7168   ;;  %v329_v47 = vstv %s492_s22 }
  0x28   : > { %v244_v6 = vmul.f32 %v242_v4, %v242_v4  ;;  %v311_v32 = vand.u32 127, %v310_v30  ;;  %v327_v44 = vld [vmem:[%s781_s2] sm:$0xff] }
  0x29   : > { %v262_v5 = vsel %vm245_vm1, %v261_v3, 0.0 }
  0x2a   : > { %263 = vadd.xlane.f32.xlu0 %v262_v5  ;;  %v246_v7 = vsel %vm245_vm1, %v244_v6, 0.0  ;;  %v344_v40 = vld [vmem:[#allocation2] sm:$0xff]  ;;  %v330_v49 = vadd.s32 %v329_v47, %v311_v32 }
  0x2b   : > { %v349_v57 = vld [vmem:[#allocation3] sm:$0xff] }
  0x2c   : > { %v335_v58 = vld [vmem:[#allocation4] sm:$0xff] }
  0x32   : > { %247 = vadd.xlane.f32.xlu0 %v246_v7 }
  0x9d   : > { %v264_v8 = vpop.xlane.xlu0 %263 }
  0x9e   : > { %v265_v9 = vmax.f32 %v264_v8, 1e-24 }
  0xa0   : > { %557 = vrsqrt.f32 %v265_v9  ;;  %vm272_vm3 = vweird.f32 %v265_v9 }
  0xa5   : > { %v248_v10 = vpop.xlane.xlu0 %247 }
  0xa6   : > { %v558_v11 = vpop.eup %557  ;;  %v249_v12 = vmax.f32 %v248_v10, 1e-24 }
  0xa7   : > { %v267_v13 = vmul.f32 %v558_v11, %v265_v9  ;;  %vm273_vm2 = vweird.f32 %v558_v11 }
  0xa8   : > { %559 = vrsqrt.f32 %v249_v12  ;;  %vm274_vm4 = vmor %vm272_vm3, %vm273_vm2  ;;  %vm256_vm6 = vweird.f32 %v249_v12 }
  0xa9   : > { %v268_v14 = vmul.f32 %v558_v11, %v267_v13 }
  0xab   : > { %v269_v15 = vmul.f32 0.5, %v268_v14 }
  0xad   : > { %v270_v16 = vsub.f32 1.5, %v269_v15 }
  0xae   : > { %v560_v17 = vpop.eup %559 }
  0xaf   : > { %v251_v18 = vmul.f32 %v560_v17, %v249_v12  ;;  %v271_v19 = vmul.f32 %v558_v11, %v270_v16  ;;  %vm257_vm5 = vweird.f32 %v560_v17 }
  0xb0   : > { %vm258_vm7 = vmor %vm256_vm6, %vm257_vm5 }
  0xb1   : > { %v252_v20 = vmul.f32 %v560_v17, %v251_v18  ;;  %v275_v21 = vsel %vm274_vm4, %v558_v11, %v271_v19 }
  0xb2   : > { %v276_v22 = vmul.f32 %v275_v21, %v243_v2 }
  0xb3   : > { %v253_v23 = vmul.f32 0.5, %v252_v20 }
  0xb4   : > { %490 = vmatpush.xpose.msk.msra.mxu0 %vm245_vm1, %v276_v22  ;;  %v303_v24 = vmul.f32 %v276_v22, %v276_v22 }
  0xb5   : > { %v254_v25 = vsub.f32 1.5, %v253_v23 }
  0xb6   : > { %v304_v26 = vsel %vm245_vm1, %v303_v24, 0.0 }
  0xb7   : > { %305 = vadd.xlane.f32.xlu1 %v304_v26  ;;  %v255_v27 = vmul.f32 %v560_v17, %v254_v25 }
  0xb9   : > { %v259_v28 = vsel %vm258_vm7, %v560_v17, %v255_v27 }
  0xba   : > { %v260_v29 = vmul.f32 %v259_v28, %v242_v4 }
  0xbc   : > { %491 = vmatmul.msk.f32.vlgmr.msra.gmra.mxu0 %vm245_vm1, %v260_v29 }
 0x12a   : > { %v306_v31 = vpop.xlane.xlu1 %305 }
 0x12b   : > { %v308_v33 = vmul.f32 8.0, %v306_v31 }
 0x12d   : > { %v312_v35 = vperm.slane %v308_v33, %v311_v32 }
 0x139   : > { %v300_v34 = vpop.f32.mrf.mxu0 }
 0x13a   : > { %v307_v36 = vmul.f32 16.0, %v300_v34 }
 0x13c   : > { %v326_v37 = vsub.f32 %v307_v36, %v312_v35 }
 0x13e   : > { %v345_v38 = vsel %vm337_vm8, %v326_v37, -inf }
 0x13f   : > { %346 = vmax.xlane.f32.xlu1 %v345_v38 }
 0x1b2   : > { %v347_v41 = vpop.xlane.xlu1 %346 }
 0x1b3   : > { %v348_v42 = vmax.f32 %v344_v40, %v347_v41 }
 0x1b5   : > { %v350_v43 = vsub.f32 %v344_v40, %v348_v42  ;;  %367 = vst.msk [vmem:[#allocation2] sm:$0xff] %vm342_vm9, %v348_v42  ;;  %356 = vperm.xlu2 %555, %v348_v42  }
 0x1b7   : > { %v351_v55 = vmul.f32 1.442695, %v350_v43 }
 0x1bd   : > { %332 = vperm.xlu2 %555, %v327_v44  }
 0x20f   : > { %v357_v45 = vpop.permute.xlu2 %356 }
 0x210   : > { %v359_v46 = vsub.f32 %v326_v37, %v357_v45 }
 0x212   : > { %v360_v48 = vmul.f32 1.442695, %v359_v46 }
 0x214   : > { %561 = vpow2.f32 %v360_v48 }
 0x215   : > { %563 = vpow2.f32 %v351_v55 }
 0x217   : > { %v333_v50 = vpop.permute.xlu2 %332 }
 0x218   : > { %vm334_vm10 = vcmp.eq.s32.totalorder %v330_v49, %v333_v50 }
 0x219   : > { %v336_v51 = vsel %vm334_vm10, %v326_v37, 0.0 }
 0x21a   : > { %v562_v52 = vpop.eup %561  ;;  %v338_v53 = vsel %vm337_vm8, %v336_v51, 0.0 }
 0x21b   : > { %339 = vadd.xlane.f32.xlu0 %v338_v53  ;;  %v362_v54 = vsel %vm337_vm8, %v562_v52, 0.0  ;;  %v564_v56 = vpop.eup %563 }
 0x21c   : > { %363 = vadd.xlane.f32.xlu1 %v362_v54  ;;  %v353_v60 = vmul.f32 %v564_v56, %v349_v57 }
 0x28e   : > { %v340_v59 = vpop.xlane.xlu0 %339  ;;  %371 = sbr.rel (%p493_p0) target bundleno = 680 (0x2a8), region = 44 }
 0x28f   : > { %v341_v61 = vadd.f32 %v340_v59, %v335_v58  ;;  %v364_v62 = vpop.xlane.xlu1 %363 }
 0x290   : > { %v365_v63 = vadd.f32 %v364_v62, %v353_v60 }
 0x291   : > { %343 = vst.msk [vmem:[#allocation4] sm:$0xff] %vm342_vm9, %v341_v61 }
 0x292   : > { %366 = vst.msk [vmem:[#allocation3] sm:$0xff] %vm342_vm9, %v365_v63 }
 0x293   : > { %v372_v2 = vld [vmem:[#allocation2] sm:$0xff] }
 0x298   : > { %v377_v4 = vld [vmem:[#allocation4] sm:$0xff] }
 0x299   : > { %v373_v0 = vld [vmem:[#allocation3] sm:$0xff] }
 0x29a   : > { %565 = vlog2.f32 %v373_v0 }
 0x2a0   : > { %v566_v1 = vpop.eup %565 }
 0x2a1   : > { %v375_v3 = vmul.f32 0.6931472, %v566_v1 }
 0x2a3   : > { %v376_v5 = vadd.f32 %v375_v3, %v372_v2 }
 0x2a5   : > { %v378_v6 = vsub.f32 %v376_v5, %v377_v4 }
 0x2a7   : > { %379 = vst.msk [vmem:[%s782_s3] sm:$0xff] %vm342_vm9, %v378_v6 }
 0x2a8 PF: > { %s16_s17 = sadd.s32 1, %s647_s17   ;;  %s785_s12 = smov %s631_s13 }
 0x2a9   : > { %p13_p1 = scmp.ge.s32.totalorder %s16_s17, 4   ;;  %s786_s13 = smov %s635_s14 }
 0x2aa   : > { %s787_s14 = smov %s721_s24  ;;  %s788_s15 = smov %s643_s16 }
 0x2ab   : > { %s789_s16 = smov %s791_s19  ;;  %15 = sbr.rel (!%p13_p1) target bundleno = 4 (0x4), region = 86 }
 0x2b0   :  { %399 = vsyncpa [#allocation6], 1 }
 0x2b1   :  { %401 = vsyncpa [#allocation6 + $0x1], 1 }

</bundles_post_ra>
